<compile_context>
chip_gen: v7x
topology: tpu7x:2x2x1
jax: 0.10.0
libtpu: 0.0.40
codegen_flags: <defaults>
</compile_context>

<pallas_src>
import functools

import jax
import jax.numpy as jnp
from jax import lax
from jax.experimental import pallas as pl
from jax.experimental.pallas import tpu as pltpu


def make_lstm_kernel(T, BB, Vp, H, A, O, P):
    """BB = per-block (padded) batch, Vp = sublane-padded vocab, P = padded head width."""
    G = 4 * H

    def kernel(ids_ref, proj_ref, w_hh_ref, w_heads_ref, b_heads_ref, out_ref):
        # ---- in-kernel embedding gather fused with the input projection ----
        # ids_ref is (T*BB, 1) int32, rows ordered t-major (row = t*BB + b).
        ids = ids_ref[...]                                           # (T*BB, 1)
        vocab_iota = lax.broadcasted_iota(jnp.int32, (T * BB, Vp), 1)
        onehot = jnp.where(vocab_iota == ids, 1.0, 0.0).astype(jnp.bfloat16)
        # proj = emb_table @ W_ih + bias (g-gate cols pre-scaled by 2), bf16.
        xw = jnp.dot(onehot, proj_ref[...],
                     preferred_element_type=jnp.float32)             # (T*BB, 4H) f32

        w_hh = w_hh_ref[...]            # (4H, 4H) bf16; rows [H:4H) are zero.

        # State kept in full 128-lane vregs; only lanes [0:H) are meaningful.
        h = jnp.zeros((BB, G), jnp.float32)
        c = jnp.zeros((BB, G), jnp.float32)

        # T is small & static: unrolled recurrence.
        for t in range(T):
            gates = (xw[t * BB:(t + 1) * BB, :]
                     + jnp.dot(h.astype(jnp.bfloat16), w_hh,
                               preferred_element_type=jnp.float32))
            # Single full-width EUP pass; tanh(g) recovered on the VPU from
            # the 2x pre-scaled g columns: tanh(x) = 2*sigmoid(2x) - 1.
            sig = jax.nn.sigmoid(gates)             # [s(i)|s(f)|2s->t(g)|s(o)]
            tg = 2.0 * sig - 1.0                    # g lanes hold tanh(g)
            f_g = pltpu.roll(sig, shift=3 * H, axis=1)  # lanes [0:H) -> s(f)
            g_g = pltpu.roll(tg, shift=2 * H, axis=1)   # lanes [0:H) -> tanh(g)
            o_g = pltpu.roll(sig, shift=H, axis=1)      # lanes [0:H) -> s(o)
            c = f_g * c + sig * g_g                     # sig lanes [0:H) = s(i)
            h = o_g * jnp.tanh(c)                       # 2nd (last) EUP pass
            # Lanes >= H hold bounded junk; zero rows of w_hh / w_heads kill it.

        # ---- fused heads: one matmul, one lane-dense 128-wide store ----
        logits = jnp.dot(h.astype(jnp.bfloat16), w_heads_ref[...],
                         preferred_element_type=jnp.float32) + b_heads_ref[...]

        lane = lax.broadcasted_iota(jnp.int32, (BB, P), 1)
        mask_a = lane < A
        mask_o = jnp.logical_and(lane >= A, lane < A + O)
        neg = jnp.float32(-1e30)

        def masked_log_softmax(mask):
            m = jnp.max(jnp.where(mask, logits, neg), axis=-1, keepdims=True)
            shifted = logits - m
            e = jnp.exp(jnp.where(mask, shifted, neg))   # masked lanes -> 0
            lse = jnp.log(jnp.sum(e, axis=-1, keepdims=True))
            return shifted - lse

        act = masked_log_softmax(mask_a)
        obj = masked_log_softmax(mask_o)
        out_ref[...] = jnp.where(mask_a, act,
                                 jnp.where(mask_o, obj, jnp.float32(0.0)))

    return kernel


def prepare_params(params):
    """One-time transform of the module params into kernel-ready tensors."""
    emb = params["embedding"].astype(jnp.float32)     # (V, E)
    w_ih = params["w_ih_t"].astype(jnp.float32)       # (E, 4H)
    w_hh = params["w_hh_t"].astype(jnp.float32)       # (H, 4H)
    bias = params["bias"].astype(jnp.float32)         # (1, 4H) = b_ih + b_hh
    w_a, b_a = params["w_action_t"], params["b_action"]   # (H, A), (1, A)
    w_o, b_o = params["w_object_t"], params["b_object"]   # (H, O), (1, O)

    V, _ = emb.shape
    H = w_hh.shape[0]
    G = 4 * H
    A = w_a.shape[1]
    O = w_o.shape[1]
    P = max(128, ((A + O + 127) // 128) * 128)   # lane-padded fused head width
    Vp = ((V + 7) // 8) * 8                      # sublane-padded vocab

    gsl = slice(2 * H, 3 * H)   # g-gate columns

    # Fold embedding gather + input projection + bias into one lookup table.
    proj = emb @ w_ih + bias                                   # (V, 4H)
    proj = proj.at[:, gsl].multiply(2.0)                       # tanh-via-sigmoid
    proj_pad = jnp.zeros((Vp, G), jnp.float32).at[:V, :].set(proj)

    # Zero-pad W_hh rows to 4H so the recurrence keeps h as a full vreg.
    w_hh_pad = jnp.zeros((G, G), jnp.float32).at[:H, :].set(w_hh)
    w_hh_pad = w_hh_pad.at[:, gsl].multiply(2.0)

    # Fused, zero-padded heads: one (4H, P) weight, one (1, P) bias.
    w_heads = jnp.zeros((G, P), jnp.float32)
    w_heads = w_heads.at[:H, :A].set(w_a).at[:H, A:A + O].set(w_o)
    b_heads = jnp.zeros((1, P), jnp.float32)
    b_heads = b_heads.at[:, :A].set(b_a).at[:, A:A + O].set(b_o)

    return {
        "proj": proj_pad.astype(jnp.bfloat16),     # MXU operand -> bf16
        "w_hh": w_hh_pad.astype(jnp.bfloat16),     # MXU operand -> bf16
        "w_heads": w_heads.astype(jnp.bfloat16),   # MXU operand -> bf16
        "b_heads": b_heads,                        # f32 (added on the VPU)
        "dims": (V, Vp, H, A, O, P),               # static python ints
    }


def armans_super_duper_lstm_forward(sentence, prepared, *, block_batch=8,
                                    min_blocks=2):
    """sentence: (B, T) int32 token ids. Returns (action_scores, object_scores)."""
    V, Vp, H, A, O, P = prepared["dims"]
    G = 4 * H
    B, T = sentence.shape

    BB = block_batch
    assert BB % 8 == 0, "block_batch must be a multiple of the 8-sublane tile"
    # Pad the batch so the grid has >= min_blocks independent ("parallel")
    # blocks: keeps both v7x TensorCores busy even at tiny B.
    B_pad = max(((B + BB - 1) // BB) * BB, min_blocks * BB)
    nblk = B_pad // BB

    # Only the token ids travel through the wrapper (tiny int32 traffic);
    # layout: per block, t-major rows (row = t*BB + b) as a lane-1 column so
    # the kernel can lane-broadcast them against the vocab iota.
    ids = jnp.pad(sentence.astype(jnp.int32), ((0, B_pad - B), (0, 0)))
    ids = (ids.reshape(nblk, BB, T).transpose(0, 2, 1)
              .reshape(nblk, T * BB, 1))

    kernel = make_lstm_kernel(T, BB, Vp, H, A, O, P)

    # TODO(synk): resident weight inputs could be single-buffered via
    # pipeline_mode=pl.Buffered(1); skipped here (negligible VMEM at this size).
    out = pl.pallas_call(
        kernel,
        out_shape=jax.ShapeDtypeStruct((B_pad, P), jnp.float32),
        grid=(nblk,),
        in_specs=[
            pl.BlockSpec((None, T * BB, 1), lambda i: (i, 0, 0)),   # token ids
            pl.BlockSpec((Vp, G), lambda i: (0, 0)),                # emb@W_ih + b
            pl.BlockSpec((G, G), lambda i: (0, 0)),                 # W_hh (padded)
            pl.BlockSpec((G, P), lambda i: (0, 0)),                 # fused heads W
            pl.BlockSpec((1, P), lambda i: (0, 0)),                 # fused heads b
        ],
        out_specs=pl.BlockSpec((BB, P), lambda i: (i, 0)),
        compiler_params=pltpu.CompilerParams(
            dimension_semantics=("parallel",)),
    )(ids, prepared["proj"], prepared["w_hh"], prepared["w_heads"],
      prepared["b_heads"])

    return out[:B, :A], out[:B, A:A + O]


def init_params(key, embedding_dim, hidden_dim, vocab_size,
                actionset_size, objectset_size):
    ks = jax.random.split(key, 8)
    scale = 0.1
    E, H = embedding_dim, hidden_dim
    return {
        "embedding":  scale * jax.random.normal(ks[0], (vocab_size, E), jnp.float32),
        "w_ih_t":     scale * jax.random.normal(ks[1], (E, 4 * H), jnp.float32),
        "w_hh_t":     scale * jax.random.normal(ks[2], (H, 4 * H), jnp.float32),
        "bias":       scale * jax.random.normal(ks[3], (1, 4 * H), jnp.float32),
        "w_action_t": scale * jax.random.normal(ks[4], (H, actionset_size), jnp.float32),
        "b_action":   scale * jax.random.normal(ks[5], (1, actionset_size), jnp.float32),
        "w_object_t": scale * jax.random.normal(ks[6], (H, objectset_size), jnp.float32),
        "b_object":   scale * jax.random.normal(ks[7], (1, objectset_size), jnp.float32),
    }


def reference_forward(sentence, params):
    """Pure-JAX f32 reference matching the PyTorch module semantics."""
    emb = params["embedding"][sentence].astype(jnp.float32)   # (B, T, E)
    B, T, _ = emb.shape
    H = params["w_hh_t"].shape[0]
    h = jnp.zeros((B, H), jnp.float32)
    c = jnp.zeros((B, H), jnp.float32)
    for t in range(T):
        g = emb[:, t, :] @ params["w_ih_t"] + h @ params["w_hh_t"] + params["bias"]
        i = jax.nn.sigmoid(g[:, 0 * H:1 * H])
        f = jax.nn.sigmoid(g[:, 1 * H:2 * H])
        gg = jnp.tanh(g[:, 2 * H:3 * H])
        o = jax.nn.sigmoid(g[:, 3 * H:4 * H])
        c = f * c + i * gg
        h = o * jnp.tanh(c)
    a = h @ params["w_action_t"] + params["b_action"]
    ob = h @ params["w_object_t"] + params["b_object"]
    return jax.nn.log_softmax(a, axis=-1), jax.nn.log_softmax(ob, axis=-1)


if __name__ == "__main__":
    B, T = 2, 8
    embedding_dim = 32
    hidden_dim = 32
    vocab_size = 20
    actionset_size = 8
    objectset_size = 10

    key = jax.random.PRNGKey(0)
    k_params, k_sent = jax.random.split(key)
    params = init_params(k_params, embedding_dim, hidden_dim, vocab_size,
                         actionset_size, objectset_size)
    sentence = jax.random.randint(k_sent, (B, T), 0, vocab_size, dtype=jnp.int32)

    # One-time param prep (padding / fusing / bf16 cast) outside the jitted path.
    prepared = prepare_params(params)

    fwd = jax.jit(functools.partial(armans_super_duper_lstm_forward,
                                    prepared=prepared))
    action_scores, object_scores = fwd(sentence)
    jax.block_until_ready((action_scores, object_scores))

    assert action_scores.shape == (B, actionset_size)
    assert object_scores.shape == (B, objectset_size)
    # log_softmax rows should sum (in prob space) to ~1 (exact up to f32 roundoff).
    assert jnp.allclose(jnp.exp(action_scores).sum(-1), 1.0, atol=1e-3)
    assert jnp.allclose(jnp.exp(object_scores).sum(-1), 1.0, atol=1e-3)

    # Cross-check against a pure-f32 JAX reference of the PyTorch module.
    # bf16 MXU operands (f32 accumulation) loosen the tolerance slightly vs the
    # all-f32 path (which met 5e-3); observed error here is ~1e-3.
    ref_act, ref_obj = reference_forward(sentence, params)
    assert jnp.allclose(action_scores, ref_act, atol=1e-2, rtol=0), (
        jnp.max(jnp.abs(action_scores - ref_act)))
    assert jnp.allclose(object_scores, ref_obj, atol=1e-2, rtol=0), (
        jnp.max(jnp.abs(object_scores - ref_obj)))

    print("KERNEL_OK")
</pallas_src>

<mosaic_0001>
module attributes {stable_mosaic.version = 11 : i64} {
  func.func @kernel(%arg0: i32, %arg1: memref<1x64x1xi32, #tpu.memory_space<vmem>>, %arg2: memref<24x128xbf16, #tpu.memory_space<vmem>>, %arg3: memref<128x128xbf16, #tpu.memory_space<vmem>>, %arg4: memref<128x128xbf16, #tpu.memory_space<vmem>>, %arg5: memref<1x128xf32, #tpu.memory_space<vmem>>, %arg6: memref<8x128xf32, #tpu.memory_space<vmem>>) attributes {dimension_semantics = [#tpu.dimension_semantics<parallel>], iteration_bounds = array<i64: 2>, scalar_prefetch = 0 : i64, scratch_operands = 0 : i64, tpu.core_type = #tpu.core_type<tc>, window_params = [{transform_indices = @transform_0, window_bounds = array<i64: 1, 64, 1>}, {pipeline_mode = #tpu.pipeline_mode<synchronous>, transform_indices = @transform_1, window_bounds = array<i64: 24, 128>}, {pipeline_mode = #tpu.pipeline_mode<synchronous>, transform_indices = @transform_2, window_bounds = array<i64: 128, 128>}, {pipeline_mode = #tpu.pipeline_mode<synchronous>, transform_indices = @transform_3, window_bounds = array<i64: 128, 128>}, {pipeline_mode = #tpu.pipeline_mode<synchronous>, transform_indices = @transform_4, window_bounds = array<i64: 1, 128>}, {transform_indices = @transform_5, window_bounds = array<i64: 8, 128>}]} {
    %c0 = arith.constant 0 : index
    %c0_0 = arith.constant 0 : index
    %c0_1 = arith.constant 0 : index
    %0 = vector.load %arg1[%c0, %c0_0, %c0_1] : memref<1x64x1xi32, #tpu.memory_space<vmem>>, vector<1x64x1xi32>
    %1 = vector.shape_cast %0 : vector<1x64x1xi32> to vector<64x1xi32>
    %2 = tpu.iota {dimensions = array<i32: 1>} : vector<64x24xi32>
    %3 = vector.broadcast %1 : vector<64x1xi32> to vector<64x24xi32>
    %4 = arith.cmpi eq, %2, %3 : vector<64x24xi32>
    %cst = arith.constant 1.000000e+00 : f32
    %cst_2 = arith.constant 0.000000e+00 : f32
    %5 = vector.broadcast %cst : f32 to vector<64x24xf32>
    %6 = vector.broadcast %cst_2 : f32 to vector<64x24xf32>
    %7 = arith.select %4, %5, %6 : vector<64x24xi1>, vector<64x24xf32>
    %8 = arith.truncf %7 : vector<64x24xf32> to vector<64x24xbf16>
    %c0_3 = arith.constant 0 : index
    %c0_4 = arith.constant 0 : index
    %9 = vector.load %arg2[%c0_3, %c0_4] : memref<24x128xbf16, #tpu.memory_space<vmem>>, vector<24x128xbf16>
    %cst_5 = arith.constant dense<0.000000e+00> : vector<64x128xf32>
    %10 = tpu.matmul %8, %9, %cst_5 {dimension_numbers = #tpu.dot_dimension_numbers<[1], [0], [0], [1], [0, 0, 1, 1], [], []>} : vector<64x24xbf16>, vector<24x128xbf16>, vector<64x128xf32> -> vector<64x128xf32>
    %c0_6 = arith.constant 0 : index
    %c0_7 = arith.constant 0 : index
    %11 = vector.load %arg3[%c0_6, %c0_7] : memref<128x128xbf16, #tpu.memory_space<vmem>>, vector<128x128xbf16>
    %cst_8 = arith.constant 0.000000e+00 : f32
    %12 = vector.broadcast %cst_8 : f32 to vector<8x128xf32>
    %cst_9 = arith.constant 0.000000e+00 : f32
    %13 = vector.broadcast %cst_9 : f32 to vector<8x128xf32>
    %14 = vector.extract_strided_slice %10 {offsets = [0, 0], sizes = [8, 128], strides = [1, 1]} : vector<64x128xf32> to vector<8x128xf32>
    %15 = arith.truncf %12 : vector<8x128xf32> to vector<8x128xbf16>
    %cst_10 = arith.constant dense<0.000000e+00> : vector<8x128xf32>
    %16 = tpu.matmul %15, %11, %cst_10 {dimension_numbers = #tpu.dot_dimension_numbers<[1], [0], [0], [1], [0, 0, 1, 1], [], []>} : vector<8x128xbf16>, vector<128x128xbf16>, vector<8x128xf32> -> vector<8x128xf32>
    %17 = arith.addf %14, %16 : vector<8x128xf32>
    %18 = arith.negf %17 : vector<8x128xf32>
    %19 = math.exp %18 : vector<8x128xf32>
    %cst_11 = arith.constant 1.000000e+00 : f32
    %20 = vector.broadcast %cst_11 : f32 to vector<8x128xf32>
    %21 = arith.addf %20, %19 : vector<8x128xf32>
    %22 = arith.divf %20, %21 : vector<8x128xf32>
    %cst_12 = arith.constant 2.000000e+00 : f32
    %23 = vector.broadcast %cst_12 : f32 to vector<8x128xf32>
    %24 = arith.mulf %23, %22 : vector<8x128xf32>
    %cst_13 = arith.constant 1.000000e+00 : f32
    %25 = vector.broadcast %cst_13 : f32 to vector<8x128xf32>
    %26 = arith.subf %24, %25 : vector<8x128xf32>
    %c96_i32 = arith.constant 96 : i32
    %27 = tpu.dynamic_rotate %22 by %c96_i32 dim 1 : vector<8x128xf32>, i32 -> vector<8x128xf32>
    %c64_i32 = arith.constant 64 : i32
    %28 = tpu.dynamic_rotate %26 by %c64_i32 dim 1 : vector<8x128xf32>, i32 -> vector<8x128xf32>
    %c32_i32 = arith.constant 32 : i32
    %29 = tpu.dynamic_rotate %22 by %c32_i32 dim 1 : vector<8x128xf32>, i32 -> vector<8x128xf32>
    %30 = arith.mulf %27, %13 : vector<8x128xf32>
    %31 = arith.mulf %22, %28 : vector<8x128xf32>
    %32 = arith.addf %30, %31 : vector<8x128xf32>
    %33 = math.tanh %32 : vector<8x128xf32>
    %34 = arith.mulf %29, %33 : vector<8x128xf32>
    %35 = vector.extract_strided_slice %10 {offsets = [8, 0], sizes = [8, 128], strides = [1, 1]} : vector<64x128xf32> to vector<8x128xf32>
    %36 = arith.truncf %34 : vector<8x128xf32> to vector<8x128xbf16>
    %cst_14 = arith.constant dense<0.000000e+00> : vector<8x128xf32>
    %37 = tpu.matmul %36, %11, %cst_14 {dimension_numbers = #tpu.dot_dimension_numbers<[1], [0], [0], [1], [0, 0, 1, 1], [], []>} : vector<8x128xbf16>, vector<128x128xbf16>, vector<8x128xf32> -> vector<8x128xf32>
    %38 = arith.addf %35, %37 : vector<8x128xf32>
    %39 = arith.negf %38 : vector<8x128xf32>
    %40 = math.exp %39 : vector<8x128xf32>
    %cst_15 = arith.constant 1.000000e+00 : f32
    %41 = vector.broadcast %cst_15 : f32 to vector<8x128xf32>
    %42 = arith.addf %41, %40 : vector<8x128xf32>
    %43 = arith.divf %41, %42 : vector<8x128xf32>
    %cst_16 = arith.constant 2.000000e+00 : f32
    %44 = vector.broadcast %cst_16 : f32 to vector<8x128xf32>
    %45 = arith.mulf %44, %43 : vector<8x128xf32>
    %cst_17 = arith.constant 1.000000e+00 : f32
    %46 = vector.broadcast %cst_17 : f32 to vector<8x128xf32>
    %47 = arith.subf %45, %46 : vector<8x128xf32>
    %c96_i32_18 = arith.constant 96 : i32
    %48 = tpu.dynamic_rotate %43 by %c96_i32_18 dim 1 : vector<8x128xf32>, i32 -> vector<8x128xf32>
    %c64_i32_19 = arith.constant 64 : i32
    %49 = tpu.dynamic_rotate %47 by %c64_i32_19 dim 1 : vector<8x128xf32>, i32 -> vector<8x128xf32>
    %c32_i32_20 = arith.constant 32 : i32
    %50 = tpu.dynamic_rotate %43 by %c32_i32_20 dim 1 : vector<8x128xf32>, i32 -> vector<8x128xf32>
    %51 = arith.mulf %48, %32 : vector<8x128xf32>
    %52 = arith.mulf %43, %49 : vector<8x128xf32>
    %53 = arith.addf %51, %52 : vector<8x128xf32>
    %54 = math.tanh %53 : vector<8x128xf32>
    %55 = arith.mulf %50, %54 : vector<8x128xf32>
    %56 = vector.extract_strided_slice %10 {offsets = [16, 0], sizes = [8, 128], strides = [1, 1]} : vector<64x128xf32> to vector<8x128xf32>
    %57 = arith.truncf %55 : vector<8x128xf32> to vector<8x128xbf16>
    %cst_21 = arith.constant dense<0.000000e+00> : vector<8x128xf32>
    %58 = tpu.matmul %57, %11, %cst_21 {dimension_numbers = #tpu.dot_dimension_numbers<[1], [0], [0], [1], [0, 0, 1, 1], [], []>} : vector<8x128xbf16>, vector<128x128xbf16>, vector<8x128xf32> -> vector<8x128xf32>
    %59 = arith.addf %56, %58 : vector<8x128xf32>
    %60 = arith.negf %59 : vector<8x128xf32>
    %61 = math.exp %60 : vector<8x128xf32>
    %cst_22 = arith.constant 1.000000e+00 : f32
    %62 = vector.broadcast %cst_22 : f32 to vector<8x128xf32>
    %63 = arith.addf %62, %61 : vector<8x128xf32>
    %64 = arith.divf %62, %63 : vector<8x128xf32>
    %cst_23 = arith.constant 2.000000e+00 : f32
    %65 = vector.broadcast %cst_23 : f32 to vector<8x128xf32>
    %66 = arith.mulf %65, %64 : vector<8x128xf32>
    %cst_24 = arith.constant 1.000000e+00 : f32
    %67 = vector.broadcast %cst_24 : f32 to vector<8x128xf32>
    %68 = arith.subf %66, %67 : vector<8x128xf32>
    %c96_i32_25 = arith.constant 96 : i32
    %69 = tpu.dynamic_rotate %64 by %c96_i32_25 dim 1 : vector<8x128xf32>, i32 -> vector<8x128xf32>
    %c64_i32_26 = arith.constant 64 : i32
    %70 = tpu.dynamic_rotate %68 by %c64_i32_26 dim 1 : vector<8x128xf32>, i32 -> vector<8x128xf32>
    %c32_i32_27 = arith.constant 32 : i32
    %71 = tpu.dynamic_rotate %64 by %c32_i32_27 dim 1 : vector<8x128xf32>, i32 -> vector<8x128xf32>
    %72 = arith.mulf %69, %53 : vector<8x128xf32>
    %73 = arith.mulf %64, %70 : vector<8x128xf32>
    %74 = arith.addf %72, %73 : vector<8x128xf32>
    %75 = math.tanh %74 : vector<8x128xf32>
    %76 = arith.mulf %71, %75 : vector<8x128xf32>
    %77 = vector.extract_strided_slice %10 {offsets = [24, 0], sizes = [8, 128], strides = [1, 1]} : vector<64x128xf32> to vector<8x128xf32>
    %78 = arith.truncf %76 : vector<8x128xf32> to vector<8x128xbf16>
    %cst_28 = arith.constant dense<0.000000e+00> : vector<8x128xf32>
    %79 = tpu.matmul %78, %11, %cst_28 {dimension_numbers = #tpu.dot_dimension_numbers<[1], [0], [0], [1], [0, 0, 1, 1], [], []>} : vector<8x128xbf16>, vector<128x128xbf16>, vector<8x128xf32> -> vector<8x128xf32>
    %80 = arith.addf %77, %79 : vector<8x128xf32>
    %81 = arith.negf %80 : vector<8x128xf32>
    %82 = math.exp %81 : vector<8x128xf32>
    %cst_29 = arith.constant 1.000000e+00 : f32
    %83 = vector.broadcast %cst_29 : f32 to vector<8x128xf32>
    %84 = arith.addf %83, %82 : vector<8x128xf32>
    %85 = arith.divf %83, %84 : vector<8x128xf32>
    %cst_30 = arith.constant 2.000000e+00 : f32
    %86 = vector.broadcast %cst_30 : f32 to vector<8x128xf32>
    %87 = arith.mulf %86, %85 : vector<8x128xf32>
    %cst_31 = arith.constant 1.000000e+00 : f32
    %88 = vector.broadcast %cst_31 : f32 to vector<8x128xf32>
    %89 = arith.subf %87, %88 : vector<8x128xf32>
    %c96_i32_32 = arith.constant 96 : i32
    %90 = tpu.dynamic_rotate %85 by %c96_i32_32 dim 1 : vector<8x128xf32>, i32 -> vector<8x128xf32>
    %c64_i32_33 = arith.constant 64 : i32
    %91 = tpu.dynamic_rotate %89 by %c64_i32_33 dim 1 : vector<8x128xf32>, i32 -> vector<8x128xf32>
    %c32_i32_34 = arith.constant 32 : i32
    %92 = tpu.dynamic_rotate %85 by %c32_i32_34 dim 1 : vector<8x128xf32>, i32 -> vector<8x128xf32>
    %93 = arith.mulf %90, %74 : vector<8x128xf32>
    %94 = arith.mulf %85, %91 : vector<8x128xf32>
    %95 = arith.addf %93, %94 : vector<8x128xf32>
    %96 = math.tanh %95 : vector<8x128xf32>
    %97 = arith.mulf %92, %96 : vector<8x128xf32>
    %98 = vector.extract_strided_slice %10 {offsets = [32, 0], sizes = [8, 128], strides = [1, 1]} : vector<64x128xf32> to vector<8x128xf32>
    %99 = arith.truncf %97 : vector<8x128xf32> to vector<8x128xbf16>
    %cst_35 = arith.constant dense<0.000000e+00> : vector<8x128xf32>
    %100 = tpu.matmul %99, %11, %cst_35 {dimension_numbers = #tpu.dot_dimension_numbers<[1], [0], [0], [1], [0, 0, 1, 1], [], []>} : vector<8x128xbf16>, vector<128x128xbf16>, vector<8x128xf32> -> vector<8x128xf32>
    %101 = arith.addf %98, %100 : vector<8x128xf32>
    %102 = arith.negf %101 : vector<8x128xf32>
    %103 = math.exp %102 : vector<8x128xf32>
    %cst_36 = arith.constant 1.000000e+00 : f32
    %104 = vector.broadcast %cst_36 : f32 to vector<8x128xf32>
    %105 = arith.addf %104, %103 : vector<8x128xf32>
    %106 = arith.divf %104, %105 : vector<8x128xf32>
    %cst_37 = arith.constant 2.000000e+00 : f32
    %107 = vector.broadcast %cst_37 : f32 to vector<8x128xf32>
    %108 = arith.mulf %107, %106 : vector<8x128xf32>
    %cst_38 = arith.constant 1.000000e+00 : f32
    %109 = vector.broadcast %cst_38 : f32 to vector<8x128xf32>
    %110 = arith.subf %108, %109 : vector<8x128xf32>
    %c96_i32_39 = arith.constant 96 : i32
    %111 = tpu.dynamic_rotate %106 by %c96_i32_39 dim 1 : vector<8x128xf32>, i32 -> vector<8x128xf32>
    %c64_i32_40 = arith.constant 64 : i32
    %112 = tpu.dynamic_rotate %110 by %c64_i32_40 dim 1 : vector<8x128xf32>, i32 -> vector<8x128xf32>
    %c32_i32_41 = arith.constant 32 : i32
    %113 = tpu.dynamic_rotate %106 by %c32_i32_41 dim 1 : vector<8x128xf32>, i32 -> vector<8x128xf32>
    %114 = arith.mulf %111, %95 : vector<8x128xf32>
    %115 = arith.mulf %106, %112 : vector<8x128xf32>
    %116 = arith.addf %114, %115 : vector<8x128xf32>
    %117 = math.tanh %116 : vector<8x128xf32>
    %118 = arith.mulf %113, %117 : vector<8x128xf32>
    %119 = vector.extract_strided_slice %10 {offsets = [40, 0], sizes = [8, 128], strides = [1, 1]} : vector<64x128xf32> to vector<8x128xf32>
    %120 = arith.truncf %118 : vector<8x128xf32> to vector<8x128xbf16>
    %cst_42 = arith.constant dense<0.000000e+00> : vector<8x128xf32>
    %121 = tpu.matmul %120, %11, %cst_42 {dimension_numbers = #tpu.dot_dimension_numbers<[1], [0], [0], [1], [0, 0, 1, 1], [], []>} : vector<8x128xbf16>, vector<128x128xbf16>, vector<8x128xf32> -> vector<8x128xf32>
    %122 = arith.addf %119, %121 : vector<8x128xf32>
    %123 = arith.negf %122 : vector<8x128xf32>
    %124 = math.exp %123 : vector<8x128xf32>
    %cst_43 = arith.constant 1.000000e+00 : f32
    %125 = vector.broadcast %cst_43 : f32 to vector<8x128xf32>
    %126 = arith.addf %125, %124 : vector<8x128xf32>
    %127 = arith.divf %125, %126 : vector<8x128xf32>
    %cst_44 = arith.constant 2.000000e+00 : f32
    %128 = vector.broadcast %cst_44 : f32 to vector<8x128xf32>
    %129 = arith.mulf %128, %127 : vector<8x128xf32>
    %cst_45 = arith.constant 1.000000e+00 : f32
    %130 = vector.broadcast %cst_45 : f32 to vector<8x128xf32>
    %131 = arith.subf %129, %130 : vector<8x128xf32>
    %c96_i32_46 = arith.constant 96 : i32
    %132 = tpu.dynamic_rotate %127 by %c96_i32_46 dim 1 : vector<8x128xf32>, i32 -> vector<8x128xf32>
    %c64_i32_47 = arith.constant 64 : i32
    %133 = tpu.dynamic_rotate %131 by %c64_i32_47 dim 1 : vector<8x128xf32>, i32 -> vector<8x128xf32>
    %c32_i32_48 = arith.constant 32 : i32
    %134 = tpu.dynamic_rotate %127 by %c32_i32_48 dim 1 : vector<8x128xf32>, i32 -> vector<8x128xf32>
    %135 = arith.mulf %132, %116 : vector<8x128xf32>
    %136 = arith.mulf %127, %133 : vector<8x128xf32>
    %137 = arith.addf %135, %136 : vector<8x128xf32>
    %138 = math.tanh %137 : vector<8x128xf32>
    %139 = arith.mulf %134, %138 : vector<8x128xf32>
    %140 = vector.extract_strided_slice %10 {offsets = [48, 0], sizes = [8, 128], strides = [1, 1]} : vector<64x128xf32> to vector<8x128xf32>
    %141 = arith.truncf %139 : vector<8x128xf32> to vector<8x128xbf16>
    %cst_49 = arith.constant dense<0.000000e+00> : vector<8x128xf32>
    %142 = tpu.matmul %141, %11, %cst_49 {dimension_numbers = #tpu.dot_dimension_numbers<[1], [0], [0], [1], [0, 0, 1, 1], [], []>} : vector<8x128xbf16>, vector<128x128xbf16>, vector<8x128xf32> -> vector<8x128xf32>
    %143 = arith.addf %140, %142 : vector<8x128xf32>
    %144 = arith.negf %143 : vector<8x128xf32>
    %145 = math.exp %144 : vector<8x128xf32>
    %cst_50 = arith.constant 1.000000e+00 : f32
    %146 = vector.broadcast %cst_50 : f32 to vector<8x128xf32>
    %147 = arith.addf %146, %145 : vector<8x128xf32>
    %148 = arith.divf %146, %147 : vector<8x128xf32>
    %cst_51 = arith.constant 2.000000e+00 : f32
    %149 = vector.broadcast %cst_51 : f32 to vector<8x128xf32>
    %150 = arith.mulf %149, %148 : vector<8x128xf32>
    %cst_52 = arith.constant 1.000000e+00 : f32
    %151 = vector.broadcast %cst_52 : f32 to vector<8x128xf32>
    %152 = arith.subf %150, %151 : vector<8x128xf32>
    %c96_i32_53 = arith.constant 96 : i32
    %153 = tpu.dynamic_rotate %148 by %c96_i32_53 dim 1 : vector<8x128xf32>, i32 -> vector<8x128xf32>
    %c64_i32_54 = arith.constant 64 : i32
    %154 = tpu.dynamic_rotate %152 by %c64_i32_54 dim 1 : vector<8x128xf32>, i32 -> vector<8x128xf32>
    %c32_i32_55 = arith.constant 32 : i32
    %155 = tpu.dynamic_rotate %148 by %c32_i32_55 dim 1 : vector<8x128xf32>, i32 -> vector<8x128xf32>
    %156 = arith.mulf %153, %137 : vector<8x128xf32>
    %157 = arith.mulf %148, %154 : vector<8x128xf32>
    %158 = arith.addf %156, %157 : vector<8x128xf32>
    %159 = math.tanh %158 : vector<8x128xf32>
    %160 = arith.mulf %155, %159 : vector<8x128xf32>
    %161 = vector.extract_strided_slice %10 {offsets = [56, 0], sizes = [8, 128], strides = [1, 1]} : vector<64x128xf32> to vector<8x128xf32>
    %162 = arith.truncf %160 : vector<8x128xf32> to vector<8x128xbf16>
    %cst_56 = arith.constant dense<0.000000e+00> : vector<8x128xf32>
    %163 = tpu.matmul %162, %11, %cst_56 {dimension_numbers = #tpu.dot_dimension_numbers<[1], [0], [0], [1], [0, 0, 1, 1], [], []>} : vector<8x128xbf16>, vector<128x128xbf16>, vector<8x128xf32> -> vector<8x128xf32>
    %164 = arith.addf %161, %163 : vector<8x128xf32>
    %165 = arith.negf %164 : vector<8x128xf32>
    %166 = math.exp %165 : vector<8x128xf32>
    %cst_57 = arith.constant 1.000000e+00 : f32
    %167 = vector.broadcast %cst_57 : f32 to vector<8x128xf32>
    %168 = arith.addf %167, %166 : vector<8x128xf32>
    %169 = arith.divf %167, %168 : vector<8x128xf32>
    %cst_58 = arith.constant 2.000000e+00 : f32
    %170 = vector.broadcast %cst_58 : f32 to vector<8x128xf32>
    %171 = arith.mulf %170, %169 : vector<8x128xf32>
    %cst_59 = arith.constant 1.000000e+00 : f32
    %172 = vector.broadcast %cst_59 : f32 to vector<8x128xf32>
    %173 = arith.subf %171, %172 : vector<8x128xf32>
    %c96_i32_60 = arith.constant 96 : i32
    %174 = tpu.dynamic_rotate %169 by %c96_i32_60 dim 1 : vector<8x128xf32>, i32 -> vector<8x128xf32>
    %c64_i32_61 = arith.constant 64 : i32
    %175 = tpu.dynamic_rotate %173 by %c64_i32_61 dim 1 : vector<8x128xf32>, i32 -> vector<8x128xf32>
    %c32_i32_62 = arith.constant 32 : i32
    %176 = tpu.dynamic_rotate %169 by %c32_i32_62 dim 1 : vector<8x128xf32>, i32 -> vector<8x128xf32>
    %177 = arith.mulf %174, %158 : vector<8x128xf32>
    %178 = arith.mulf %169, %175 : vector<8x128xf32>
    %179 = arith.addf %177, %178 : vector<8x128xf32>
    %180 = math.tanh %179 : vector<8x128xf32>
    %181 = arith.mulf %176, %180 : vector<8x128xf32>
    %182 = arith.truncf %181 : vector<8x128xf32> to vector<8x128xbf16>
    %c0_63 = arith.constant 0 : index
    %c0_64 = arith.constant 0 : index
    %183 = vector.load %arg4[%c0_63, %c0_64] : memref<128x128xbf16, #tpu.memory_space<vmem>>, vector<128x128xbf16>
    %cst_65 = arith.constant dense<0.000000e+00> : vector<8x128xf32>
    %184 = tpu.matmul %182, %183, %cst_65 {dimension_numbers = #tpu.dot_dimension_numbers<[1], [0], [0], [1], [0, 0, 1, 1], [], []>} : vector<8x128xbf16>, vector<128x128xbf16>, vector<8x128xf32> -> vector<8x128xf32>
    %c0_66 = arith.constant 0 : index
    %c0_67 = arith.constant 0 : index
    %185 = vector.load %arg5[%c0_66, %c0_67] : memref<1x128xf32, #tpu.memory_space<vmem>>, vector<1x128xf32>
    %186 = vector.broadcast %185 : vector<1x128xf32> to vector<8x128xf32>
    %187 = arith.addf %184, %186 : vector<8x128xf32>
    %188 = tpu.iota {dimensions = array<i32: 1>} : vector<8x128xi32>
    %c8_i32 = arith.constant 8 : i32
    %189 = vector.broadcast %c8_i32 : i32 to vector<8x128xi32>
    %190 = arith.cmpi slt, %188, %189 : vector<8x128xi32>
    %c8_i32_68 = arith.constant 8 : i32
    %191 = vector.broadcast %c8_i32_68 : i32 to vector<8x128xi32>
    %192 = arith.cmpi sge, %188, %191 : vector<8x128xi32>
    %c18_i32 = arith.constant 18 : i32
    %193 = vector.broadcast %c18_i32 : i32 to vector<8x128xi32>
    %194 = arith.cmpi slt, %188, %193 : vector<8x128xi32>
    %195 = arith.andi %192, %194 : vector<8x128xi1>
    %cst_69 = arith.constant -1.000000e+30 : f32
    %196 = vector.broadcast %cst_69 : f32 to vector<8x128xf32>
    %197 = arith.select %190, %187, %196 : vector<8x128xi1>, vector<8x128xf32>
    %cst_70 = arith.constant dense<0xFF800000> : vector<8xf32>
    %198 = vector.multi_reduction <maximumf>, %197, %cst_70 [1] : vector<8x128xf32> to vector<8xf32>
    %199 = vector.shape_cast %198 : vector<8xf32> to vector<8x1xf32>
    %200 = vector.broadcast %199 : vector<8x1xf32> to vector<8x128xf32>
    %201 = arith.subf %187, %200 : vector<8x128xf32>
    %cst_71 = arith.constant -1.000000e+30 : f32
    %202 = vector.broadcast %cst_71 : f32 to vector<8x128xf32>
    %203 = arith.select %190, %201, %202 : vector<8x128xi1>, vector<8x128xf32>
    %204 = math.exp %203 : vector<8x128xf32>
    %cst_72 = arith.constant dense<0.000000e+00> : vector<8xf32>
    %205 = vector.multi_reduction <add>, %204, %cst_72 [1] : vector<8x128xf32> to vector<8xf32>
    %206 = vector.shape_cast %205 : vector<8xf32> to vector<8x1xf32>
    %207 = math.log %206 : vector<8x1xf32>
    %208 = vector.broadcast %207 : vector<8x1xf32> to vector<8x128xf32>
    %209 = arith.subf %201, %208 : vector<8x128xf32>
    %cst_73 = arith.constant -1.000000e+30 : f32
    %210 = vector.broadcast %cst_73 : f32 to vector<8x128xf32>
    %211 = arith.select %195, %187, %210 : vector<8x128xi1>, vector<8x128xf32>
    %cst_74 = arith.constant dense<0xFF800000> : vector<8xf32>
    %212 = vector.multi_reduction <maximumf>, %211, %cst_74 [1] : vector<8x128xf32> to vector<8xf32>
    %213 = vector.shape_cast %212 : vector<8xf32> to vector<8x1xf32>
    %214 = vector.broadcast %213 : vector<8x1xf32> to vector<8x128xf32>
    %215 = arith.subf %187, %214 : vector<8x128xf32>
    %cst_75 = arith.constant -1.000000e+30 : f32
    %216 = vector.broadcast %cst_75 : f32 to vector<8x128xf32>
    %217 = arith.select %195, %215, %216 : vector<8x128xi1>, vector<8x128xf32>
    %218 = math.exp %217 : vector<8x128xf32>
    %cst_76 = arith.constant dense<0.000000e+00> : vector<8xf32>
    %219 = vector.multi_reduction <add>, %218, %cst_76 [1] : vector<8x128xf32> to vector<8xf32>
    %220 = vector.shape_cast %219 : vector<8xf32> to vector<8x1xf32>
    %221 = math.log %220 : vector<8x1xf32>
    %222 = vector.broadcast %221 : vector<8x1xf32> to vector<8x128xf32>
    %223 = arith.subf %215, %222 : vector<8x128xf32>
    %cst_77 = arith.constant 0.000000e+00 : f32
    %224 = vector.broadcast %cst_77 : f32 to vector<8x128xf32>
    %225 = arith.select %195, %223, %224 : vector<8x128xi1>, vector<8x128xf32>
    %226 = arith.select %190, %209, %225 : vector<8x128xi1>, vector<8x128xf32>
    %c0_78 = arith.constant 0 : index
    %c0_79 = arith.constant 0 : index
    %227 = vector.load %arg6[%c0_78, %c0_79] : memref<8x128xf32, #tpu.memory_space<vmem>>, vector<8x128xf32>
    tpu.vector_store %arg6[%c0_78, %c0_79], %226 {strides = array<i32>} : memref<8x128xf32, #tpu.memory_space<vmem>>, vector<8x128xf32>,
    return
  }
  func.func @transform_0(%arg0: i32) -> (i32, i32, i32) {
    %c0_i32 = arith.constant 0 : i32
    %c0_i32_0 = arith.constant 0 : i32
    %c0_i32_1 = arith.constant 0 : i32
    return %arg0, %c0_i32, %c0_i32_0 : i32, i32, i32
  }
  func.func @transform_1(%arg0: i32) -> (i32, i32) {
    %c0_i32 = arith.constant 0 : i32
    %c0_i32_0 = arith.constant 0 : i32
    %c0_i32_1 = arith.constant 0 : i32
    return %c0_i32, %c0_i32_0 : i32, i32
  }
  func.func @transform_2(%arg0: i32) -> (i32, i32) {
    %c0_i32 = arith.constant 0 : i32
    %c0_i32_0 = arith.constant 0 : i32
    %c0_i32_1 = arith.constant 0 : i32
    return %c0_i32, %c0_i32_0 : i32, i32
  }
  func.func @transform_3(%arg0: i32) -> (i32, i32) {
    %c0_i32 = arith.constant 0 : i32
    %c0_i32_0 = arith.constant 0 : i32
    %c0_i32_1 = arith.constant 0 : i32
    return %c0_i32, %c0_i32_0 : i32, i32
  }
  func.func @transform_4(%arg0: i32) -> (i32, i32) {
    %c0_i32 = arith.constant 0 : i32
    %c0_i32_0 = arith.constant 0 : i32
    %c0_i32_1 = arith.constant 0 : i32
    return %c0_i32, %c0_i32_0 : i32, i32
  }
  func.func @transform_5(%arg0: i32) -> (i32, i32) {
    %c0_i32 = arith.constant 0 : i32
    %c0_i32_0 = arith.constant 0 : i32
    return %arg0, %c0_i32 : i32, i32
  }
}

</mosaic_0001>

<bundles_post_ra>
// kernel: armans_super_duper_lstm_forward.1
= control target key start
LH: loop header
LB: loop body
LE: loop exit
PB: predicated region body
PF: predicated region fallthrough
CT: control target
= control target key end

     0   :  { %s1583_s18 = smov 0   ;;  %s1914_s0 = inlined_call_operand.vmem [shape: s32[2,64,1], index: 0, kind: input, shape index: {}]   ;;  %s1915_s1 = inlined_call_operand.vmem [shape: bf16[24,128], index: 1, kind: input, shape index: {}]   ;;  %s1916_s2 = inlined_call_operand.vmem [shape: bf16[128,128], index: 2, kind: input, shape index: {}]   ;;  %s1917_s3 = inlined_call_operand.vmem [shape: bf16[128,128], index: 3, kind: input, shape index: {}]   ;;  %s1918_s4 = inlined_call_operand.vmem [shape: f32[1,128], index: 4, kind: input, shape index: {}]   ;;  %s1919_s5 = inlined_call_operand.vmem [shape: f32[16,128], index: 5, kind: output, shape index: {}]  }
   0x1 LB: > { %s1119_s19 = sadd.s32 4294967295, %s1545_s18   ;;  %p1123_p0 = scmp.ge.s32.totalorder %s1545_s18, 1  ;;  %s1545_s18 = sphi %s1583_s18, %s15_s18  }
   0x2   : > { %p187_p1 = scmp.lt.s32.totalorder %s1545_s18, 3 }
   0x4   : > { %p188_p2 = pnand %p1123_p0, %p187_p1 }
   0x5   : > { %p214_p3 = scmp.lt.s32.totalorder (!%p188_p2), %s1119_s19, 1  ;;  %v1594_v0 = vld [vmem:[%s1916_s2] sm:$0xff] (!%p188_p2)   ;;  %v1547_v1 = vmov (!%p188_p2), 0   ;;  %v1548_v2 = vmov (!%p188_p2), 0.0   ;;  %v1605_v3 = vld [vmem:[%s1916_s2 + $0x8] sm:$0xff] (!%p188_p2)   ;;  %v1614_v8 = vld [vmem:[%s1916_s2 + $0x10] sm:$0xff] (!%p188_p2)   ;;  %v232_v21 = vlaneseq (!%p188_p2) }
   0x6   : > { %191 = sbr.rel (%p188_p2) target bundleno = 3715 (0xe83), region = 40  ;;  %1464 = vset.pattern.permute.xlu1 (!%p188_p2), %v1547_v1  ;;  %1463 = vset.pattern.permute.xlu0 (!%p188_p2), %v1547_v1  ;;  %v1620_v9 = vld [vmem:[%s1916_s2 + $0x18] sm:$0xff] (!%p188_p2)   ;;  %v1472_v10 = vld [vmem:[%s1915_s1] sm:$0xff] (!%p188_p2)   ;;  %vm303_vm0 = vcmask (!%p188_p2), 1043456   ;;  %v1474_v13 = vld [vmem:[%s1915_s1 + $0x8] ss:$0 sps:$4 sm:$0xff] (!%p188_p2)  }
   0x7   : > { %1268 = vmatprep.subr.bf16.mxu1 (!%p188_p2), %v1548_v2  ;;  %1256 = vmatprep.subr.bf16.mxu0 (!%p188_p2), %v1472_v10  ;;  %v1633_v16 = vld [vmem:[%s1916_s2 + $0x20] sm:$0xff] (!%p188_p2)   ;;  %v305_v17 = vsel (!%p188_p2), %vm303_vm0, %v1474_v13, 0  ;;  %vm1549_vm1 = vmmov (!%p188_p2), 0   ;;  %v1644_v18 = vld [vmem:[%s1916_s2 + $0x28] sm:$0xff] (!%p188_p2)   ;;  %v1651_v19 = vld [vmem:[%s1916_s2 + $0x30] sm:$0xff] (!%p188_p2)   ;;  %v1681_v22 = vand.u32 (!%p188_p2), 127, %v232_v21 }
   0x8   : > { %1269 = vmatpush3.bf16.msra.mxu1 (!%p188_p2), %v1594_v0  ;;  %1257 = vmatpush3.bf16.msra.mxu0 (!%p188_p2), %v1472_v10  ;;  %v1658_v20 = vld [vmem:[%s1916_s2 + $0x38] sm:$0xff] (!%p188_p2)   ;;  %vm290_vm6 = vcmask (!%p188_p2), 195584   ;;  %s1550_s21 = smov (!%p188_p2), 96   ;;  %s1552_s23 = smov (!%p188_p2), 64  }
   0x9   : > { %1270 = vmatprep.subr.bf16.mxu1 (!%p188_p2), %v1548_v2  ;;  %1448 = vmatprep.subr.msk.bf16.mxu0 (!%p188_p2), %vm303_vm0, %v1474_v13  ;;  %vm1036_vm11 = vcmp.ge.s32.totalorder (!%p188_p2), %v1681_v22, 8  ;;  %vm1037_vm12 = vcmp.lt.s32.totalorder (!%p188_p2), %v1681_v22, 18  ;;  %vm1035_vm14 = vcmp.lt.s32.totalorder (!%p188_p2), %v1681_v22, 8 }
   0xa   : > { %1284 = vmatprep.mubr.msk.bf16.mxu1 (!%p188_p2), %vm1549_vm1, %v1548_v2  ;;  %vm1890_vm13 = vmand (!%p188_p2), %vm1036_vm11, %vm1037_vm12 }
   0xc   : > { %1271 = vmatpush3.bf16.msra.mxu1 (!%p188_p2), %v1605_v3  ;;  %1259 = vmatpush3.bf16.msra.mxu0 (!%p188_p2), %v305_v17 }
   0xd   : > { %s1923_s19 = smov (!%p214_p3, %s1119_s19), 1  ;;  %1272 = vmatprep.subr.bf16.mxu1 %v1548_v2  ;;  %1288 = vmatprep.subr.bf16.mxu0 %v1548_v2 }
   0xe   : > { %s1168_s22 = sshll.u32 %s1923_s19, 6  ;;  %s1126_s17 = sshll.u32 %s1923_s19, 3 }
   0xf   : > { %s218_s27 = scalar_lea.vmem %s1914_s0, %s1168_s22  ;;  %s1551_s22 = smov 32  }
  0x10   : > { %v226_v4 = vld [vmem:[%s218_s27 + $0x10] sm:$0xff]  ;;  %v224_v5 = vld [vmem:[%s218_s27] sm:$0xff]  ;;  %v227_v6 = vld [vmem:[%s218_s27 + $0x18] sm:$0xff]  ;;  %1273 = vmatpush3.bf16.msra.mxu1 %v1614_v8 }
  0x11   : > { %241 = vperm.xlu1 %1464, %v226_v4   ;;  %235 = vperm.xlu0 %1463, %v224_v5   ;;  %v225_v7 = vld [vmem:[%s218_s27 + $0x8] sm:$0xff]  ;;  %v228_v12 = vld [vmem:[%s218_s27 + $0x20] sm:$0xff]  ;;  %v231_v14 = vld [vmem:[%s218_s27 + $0x38] sm:$0xff] }
  0x12   : > { %v229_v11 = vld [vmem:[%s218_s27 + $0x28] sm:$0xff]  ;;  %1274 = vmatprep.subr.bf16.mxu1 %v1548_v2  ;;  %v230_v15 = vld [vmem:[%s218_s27 + $0x30] sm:$0xff] }
  0x14   : > { %1275 = vmatpush3.bf16.msra.mxu1 %v1620_v9 }
  0x15   : > { %244 = vperm.xlu1 %1464, %v227_v6   ;;  %238 = vperm.xlu0 %1463, %v225_v7  }
  0x16   : > { %1276 = vmatprep.subr.bf16.mxu1 %v1548_v2 }
  0x18   : > { %1277 = vmatpush3.bf16.msra.mxu1 %v1633_v16 }
  0x19   : > { %250 = vperm.xlu1 %1464, %v229_v11   ;;  %247 = vperm.xlu0 %1463, %v228_v12  }
  0x1a   : > { %1278 = vmatprep.subr.bf16.mxu1 %v1548_v2 }
  0x1c   : > { %1279 = vmatpush3.bf16.msra.mxu1 %v1644_v18 }
  0x1d   : > { %256 = vperm.xlu1 %1464, %v231_v14   ;;  %253 = vperm.xlu0 %1463, %v230_v15  }
  0x1e   : > { %1280 = vmatprep.subr.bf16.mxu1 %v1548_v2 }
  0x20   : > { %1281 = vmatpush3.bf16.msra.mxu1 %v1651_v19 }
  0x21   : > { %1282 = vmatprep.subr.bf16.mxu1 %v1548_v2 }
  0x24   : > { %1283 = vmatpush3.bf16.msra.mxu1 %v1658_v20 }
  0x25   : > { %1308 = vmatprep.subr.bf16.mxu1 %v1548_v2 }
  0x27   : > { %1285 = vmatmul.mubr.bf16.vlgmr.msra.gmra.mrb[0].mxu1 %v1547_v1 }
  0x28   : > { %1309 = vmatpush3.bf16.msra.mxu1 %v1594_v0  ;;  %1324 = vmatprep.mubr.msk.bf16.mxu1 %vm1549_vm1, %v1548_v2 }
  0x29   : > { %1310 = vmatprep.subr.bf16.mxu1 %v1548_v2 }
  0x2c   : > { %1311 = vmatpush3.bf16.msra.mxu1 %v1605_v3 }
  0x2d   : > { %1312 = vmatprep.subr.bf16.mxu1 %v1548_v2 }
  0x30   : > { %1313 = vmatpush3.bf16.msra.mxu1 %v1614_v8 }
  0x31   : > { %1314 = vmatprep.subr.bf16.mxu1 %v1548_v2 }
  0x34   : > { %1315 = vmatpush3.bf16.msra.mxu1 %v1620_v9 }
  0x35   : > { %1316 = vmatprep.subr.bf16.mxu1 %v1548_v2 }
  0x38   : > { %1317 = vmatpush3.bf16.msra.mxu1 %v1633_v16 }
  0x39   : > { %1318 = vmatprep.subr.bf16.mxu1 %v1548_v2 }
  0x3c   : > { %1319 = vmatpush3.bf16.msra.mxu1 %v1644_v18 }
  0x3d   : > { %1320 = vmatprep.subr.bf16.mxu1 %v1548_v2 }
  0x40   : > { %1321 = vmatpush3.bf16.msra.mxu1 %v1651_v19 }
  0x41   : > { %1322 = vmatprep.subr.bf16.mxu1 %v1548_v2 }
  0x44   : > { %1323 = vmatpush3.bf16.msra.mxu1 %v1658_v20 }
  0x45   : > { %1348 = vmatprep.subr.bf16.mxu1 %v1548_v2 }
  0x90   : > { %v242_v23 = vpop.permute.xlu1 %241  ;;  %v236_v24 = vpop.permute.xlu0 %235 }
  0x91   : > { %vm260_vm2 = vcmp.eq.s32.totalorder %v1681_v22, %v242_v23  ;;  %vm258_vm3 = vcmp.eq.s32.totalorder %v1681_v22, %v236_v24 }
  0x92   : > { %v268_v27 = vsel %vm260_vm2, 1.0, %v1548_v2  ;;  %v266_v28 = vsel %vm258_vm3, 1.0, %v1548_v2 }
  0x94   : > { %v245_v25 = vpop.permute.xlu1 %244  ;;  %v239_v26 = vpop.permute.xlu0 %238 }
  0x95   : > { %vm261_vm4 = vcmp.eq.s32.totalorder %v1681_v22, %v245_v25  ;;  %vm259_vm5 = vcmp.eq.s32.totalorder %v1681_v22, %v239_v26 }
  0x96   : > { %v269_v29 = vsel %vm261_vm4, 1.0, %v1548_v2  ;;  %v267_v30 = vsel %vm259_vm5, 1.0, %v1548_v2 }
  0x97   : > { %v275_v31 = vpack.c.bf16 %v269_v29, %v268_v27  ;;  %v274_v32 = vpack.c.bf16 %v267_v30, %v266_v28 }
  0x98   : > { %v251_v33 = vpop.permute.xlu1 %250  ;;  %v248_v34 = vpop.permute.xlu0 %247 }
  0x99   : > { %vm263_vm7 = vcmp.eq.s32.totalorder %v1681_v22, %v251_v33  ;;  %vm262_vm8 = vcmp.eq.s32.totalorder %v1681_v22, %v248_v34  ;;  %1260 = vmatprep.mubr.msk.bf16.mxu0 %vm290_vm6, %v274_v32 }
  0x9a   : > { %v271_v35 = vsel %vm263_vm7, 1.0, %v1548_v2  ;;  %v270_v36 = vsel %vm262_vm8, 1.0, %v1548_v2  ;;  %1261 = vmatmul.mubr.msk.bf16.vlgmr.msra.gmra.mrb[0].mxu0 %vm290_vm6, %v275_v31 }
  0x9b   : > { %v276_v37 = vpack.c.bf16 %v271_v35, %v270_v36  ;;  %1289 = vmatpush3.bf16.msra.mxu0 %v1594_v0 }
  0x9c   : > { %v257_v38 = vpop.permute.xlu1 %256  ;;  %v254_v39 = vpop.permute.xlu0 %253  ;;  %1290 = vmatprep.subr.bf16.mxu0 %v1548_v2 }
  0x9d   : > { %vm265_vm9 = vcmp.eq.s32.totalorder %v1681_v22, %v257_v38  ;;  %vm264_vm10 = vcmp.eq.s32.totalorder %v1681_v22, %v254_v39  ;;  %1264 = vmatprep.mubr.msk.bf16.mxu0 %vm290_vm6, %v276_v37 }
  0x9e   : > { %v273_v40 = vsel %vm265_vm9, 1.0, %v1548_v2  ;;  %v272_v41 = vsel %vm264_vm10, 1.0, %v1548_v2 }
  0x9f   : > { %v277_v42 = vpack.c.bf16 %v273_v40, %v272_v41  ;;  %1291 = vmatpush3.bf16.msra.mxu0 %v1605_v3 }
  0xa0   : > { %1292 = vmatprep.subr.bf16.mxu0 %v1548_v2 }
  0xa2   : > { %1265 = vmatmul.mubr.msk.bf16.gmra.mrb[4].mxu0 %vm290_vm6, %v277_v42 }
  0xa3   : > { %1293 = vmatpush3.bf16.msra.mxu0 %v1614_v8  ;;  %1304 = vmatprep.mubr.msk.bf16.mxu0 %vm1549_vm1, %v1548_v2 }
  0xa4   : > { %1294 = vmatprep.subr.bf16.mxu0 %v1548_v2 }
  0xa7   : > { %1295 = vmatpush3.bf16.msra.mxu0 %v1620_v9 }
  0xa8   : > { %1296 = vmatprep.subr.bf16.mxu0 %v1548_v2 }
  0xab   : > { %1297 = vmatpush3.bf16.msra.mxu0 %v1633_v16 }
  0xac   : > { %1298 = vmatprep.subr.bf16.mxu0 %v1548_v2 }
  0xaf   : > { %1299 = vmatpush3.bf16.msra.mxu0 %v1644_v18 }
  0xb0   : > { %1300 = vmatprep.subr.bf16.mxu0 %v1548_v2 }
  0xb3   : > { %1301 = vmatpush3.bf16.msra.mxu0 %v1651_v19 }
  0xb4   : > { %1302 = vmatprep.subr.bf16.mxu0 %v1548_v2 }
  0xb7   : > { %1303 = vmatpush3.bf16.msra.mxu0 %v1658_v20 }
  0xb8   : > { %1328 = vmatprep.subr.bf16.mxu0 %v1548_v2 }
  0xfa   : > { %v470_v43 = vpop.f32.mrb[0].mxu1 }
  0xfb   : > { %v1286_v44 = vpop.f32.mrb[1].mxu1 }
  0xfc   : > { %v473_v45 = vpop.f32.mrb[2].mxu1 }
  0xfd   : > { %v1287_v46 = vpop.f32.mrb[3].mxu1 }
 0x16d   : > { %v1721_v47 = vpop.f32.mrb[0].mxu0 }
 0x16e   : > { %v341_v48 = vpop.f32.mrb[1].mxu0 }
 0x16f   : > { %v476_v49 = vadd.f32 %v470_v43, %v341_v48  ;;  %v1723_v50 = vpop.f32.mrb[2].mxu0 }
 0x170   : > { %v344_v51 = vpop.f32.mrb[3].mxu0 }
 0x171   : > { %v1141_v52 = vmul.f32 -1.442695, %v476_v49 }
 0x173   : > { %1483 = vpow2.f32 %v1141_v52 }
 0x175   : > { %v1725_v53 = vpop.f32.mrb[4].mxu0 }
 0x176   : > { %v1727_v54 = vpop.f32.mrb[5].mxu0 }
 0x177   : > { %v1729_v55 = vpop.f32.mrb[6].mxu0 }
 0x178   : > { %v1731_v56 = vpop.f32.mrb[7].mxu0 }
 0x17d   : > { %v1484_v57 = vpop.eup %1483 }
 0x17e   : > { %v480_v58 = vadd.f32 1.0, %v1484_v57 }
 0x180   : > { %1485 = vrcp.f32 %v480_v58 }
 0x18a   : > { %v1486_v59 = vpop.eup %1485 }
 0x18b   : > { %485 = vrot.lane.b32.xlu0 %v1486_v59, %s1550_s21  ;;  %v483_v60 = vmul.f32 2.0, %v1486_v59 }
 0x18d   : > { %v1142_v61 = vadd.f32 -1.0, %v483_v60 }
 0x18f   : > { %489 = vrot.lane.b32.xlu0 %v1486_v59, %s1551_s22  ;;  %487 = vrot.lane.b32.xlu1 %v1142_v61, %s1552_s23 }
 0x1fd   : > { %v486_v62 = vpop.permute.xlu0 %485 }
 0x1fe   : > { %v491_v1 = vmul.f32 0.0, %v486_v62 }
 0x201   : > { %v488_v63 = vpop.permute.xlu1 %487  ;;  %v490_v7 = vpop.permute.xlu0 %489 }
 0x202   : > { %v492_v4 = vmul.f32 %v1486_v59, %v488_v63 }
 0x204   : > { %v493_v5 = vadd.f32 %v492_v4, %v491_v1 }
 0x206   : > { %1487 = vtanh.f32 %v493_v5 }
 0x210   : > { %v1488_v6 = vpop.eup %1487 }
 0x211   : > { %v495_v10 = vmul.f32 %v1488_v6, %v490_v7 }
 0x213   : > { %v496_v11 = vpack.c.bf16 %v495_v10, %v495_v10 }
 0x215   : > { %1305 = vmatmul.mubr.bf16.vlgmr.msra.gmra.mrb[8].mxu0 %v496_v11 }
 0x216   : > { %1329 = vmatpush3.bf16.msra.mxu0 %v1594_v0  ;;  %1344 = vmatprep.mubr.msk.bf16.mxu0 %vm1549_vm1, %v1548_v2 }
 0x217   : > { %1330 = vmatprep.subr.bf16.mxu0 %v1548_v2 }
 0x21a   : > { %1331 = vmatpush3.bf16.msra.mxu0 %v1605_v3 }
 0x21b   : > { %1332 = vmatprep.subr.bf16.mxu0 %v1548_v2 }
 0x21e   : > { %1333 = vmatpush3.bf16.msra.mxu0 %v1614_v8 }
 0x21f   : > { %1334 = vmatprep.subr.bf16.mxu0 %v1548_v2 }
 0x222   : > { %1335 = vmatpush3.bf16.msra.mxu0 %v1620_v9 }
 0x223   : > { %1336 = vmatprep.subr.bf16.mxu0 %v1548_v2 }
 0x226   : > { %1337 = vmatpush3.bf16.msra.mxu0 %v1633_v16 }
 0x227   : > { %1338 = vmatprep.subr.bf16.mxu0 %v1548_v2 }
 0x22a   : > { %1339 = vmatpush3.bf16.msra.mxu0 %v1644_v18 }
 0x22b   : > { %1340 = vmatprep.subr.bf16.mxu0 %v1548_v2 }
 0x22e   : > { %1341 = vmatpush3.bf16.msra.mxu0 %v1651_v19 }
 0x22f   : > { %1342 = vmatprep.subr.bf16.mxu0 %v1548_v2 }
 0x232   : > { %1343 = vmatpush3.bf16.msra.mxu0 %v1658_v20 }
 0x233   : > { %1368 = vmatprep.subr.bf16.mxu0 %v1548_v2 }
 0x2e8   : > { %v531_v12 = vpop.f32.mrb[8].mxu0 }
 0x2e9   : > { %v537_v13 = vadd.f32 %v531_v12, %v344_v51  ;;  %v1306_v14 = vpop.f32.mrb[9].mxu0 }
 0x2ea   : > { %v534_v15 = vpop.f32.mrb[10].mxu0 }
 0x2eb   : > { %v1143_v17 = vmul.f32 -1.442695, %v537_v13  ;;  %v1307_v21 = vpop.f32.mrb[11].mxu0 }
 0x2ed   : > { %1489 = vpow2.f32 %v1143_v17 }
 0x2f7   : > { %v1490_v23 = vpop.eup %1489 }
 0x2f8   : > { %v541_v24 = vadd.f32 1.0, %v1490_v23 }
 0x2fa   : > { %1491 = vrcp.f32 %v541_v24 }
 0x304   : > { %v1492_v25 = vpop.eup %1491 }
 0x305   : > { %546 = vrot.lane.b32.xlu1 %v1492_v25, %s1550_s21  ;;  %v544_v26 = vmul.f32 2.0, %v1492_v25 }
 0x307   : > { %v1144_v27 = vadd.f32 -1.0, %v544_v26 }
 0x309   : > { %550 = vrot.lane.b32.xlu1 %v1492_v25, %s1551_s22  ;;  %548 = vrot.lane.b32.xlu0 %v1144_v27, %s1552_s23 }
 0x377   : > { %v547_v28 = vpop.permute.xlu1 %546 }
 0x378   : > { %v552_v30 = vmul.f32 %v547_v28, %v493_v5 }
 0x37b   : > { %v549_v29 = vpop.permute.xlu0 %548  ;;  %v551_v34 = vpop.permute.xlu1 %550 }
 0x37c   : > { %v553_v31 = vmul.f32 %v1492_v25, %v549_v29 }
 0x37e   : > { %v554_v32 = vadd.f32 %v553_v31, %v552_v30 }
 0x380   : > { %1493 = vtanh.f32 %v554_v32 }
 0x38a   : > { %v1494_v33 = vpop.eup %1493 }
 0x38b   : > { %v556_v35 = vmul.f32 %v1494_v33, %v551_v34 }
 0x38d   : > { %v557_v36 = vpack.c.bf16 %v556_v35, %v556_v35 }
 0x38f   : > { %1325 = vmatmul.mubr.bf16.vlgmr.msra.gmra.mrb[4].mxu1 %v557_v36 }
 0x390   : > { %1349 = vmatpush3.bf16.msra.mxu1 %v1594_v0  ;;  %1364 = vmatprep.mubr.msk.bf16.mxu1 %vm1549_vm1, %v1548_v2 }
 0x391   : > { %1350 = vmatprep.subr.bf16.mxu1 %v1548_v2 }
 0x394   : > { %1351 = vmatpush3.bf16.msra.mxu1 %v1605_v3 }
 0x395   : > { %1352 = vmatprep.subr.bf16.mxu1 %v1548_v2 }
 0x398   : > { %1353 = vmatpush3.bf16.msra.mxu1 %v1614_v8 }
 0x399   : > { %1354 = vmatprep.subr.bf16.mxu1 %v1548_v2 }
 0x39c   : > { %1355 = vmatpush3.bf16.msra.mxu1 %v1620_v9 }
 0x39d   : > { %1356 = vmatprep.subr.bf16.mxu1 %v1548_v2 }
 0x3a0   : > { %1357 = vmatpush3.bf16.msra.mxu1 %v1633_v16 }
 0x3a1   : > { %1358 = vmatprep.subr.bf16.mxu1 %v1548_v2 }
 0x3a4   : > { %1359 = vmatpush3.bf16.msra.mxu1 %v1644_v18 }
 0x3a5   : > { %1360 = vmatprep.subr.bf16.mxu1 %v1548_v2 }
 0x3a8   : > { %1361 = vmatpush3.bf16.msra.mxu1 %v1651_v19 }
 0x3a9   : > { %1362 = vmatprep.subr.bf16.mxu1 %v1548_v2 }
 0x3ac   : > { %1363 = vmatpush3.bf16.msra.mxu1 %v1658_v20 }
 0x3ad   : > { %1388 = vmatprep.subr.bf16.mxu1 %v1548_v2 }
 0x462   : > { %v592_v37 = vpop.f32.mrb[4].mxu1 }
 0x463   : > { %v598_v38 = vadd.f32 %v1721_v47, %v592_v37  ;;  %v1326_v39 = vpop.f32.mrb[5].mxu1 }
 0x464   : > { %v595_v40 = vpop.f32.mrb[6].mxu1 }
 0x465   : > { %v1145_v41 = vmul.f32 -1.442695, %v598_v38  ;;  %v1327_v42 = vpop.f32.mrb[7].mxu1 }
 0x467   : > { %1495 = vpow2.f32 %v1145_v41 }
 0x471   : > { %v1496_v43 = vpop.eup %1495 }
 0x472   : > { %v602_v44 = vadd.f32 1.0, %v1496_v43 }
 0x474   : > { %1497 = vrcp.f32 %v602_v44 }
 0x47e   : > { %v1498_v45 = vpop.eup %1497 }
 0x47f   : > { %607 = vrot.lane.b32.xlu0 %v1498_v45, %s1550_s21  ;;  %v605_v46 = vmul.f32 2.0, %v1498_v45 }
 0x481   : > { %v1146_v48 = vadd.f32 -1.0, %v605_v46 }
 0x483   : > { %611 = vrot.lane.b32.xlu0 %v1498_v45, %s1551_s22  ;;  %609 = vrot.lane.b32.xlu1 %v1146_v48, %s1552_s23 }
 0x4f1   : > { %v608_v49 = vpop.permute.xlu0 %607 }
 0x4f2   : > { %v613_v47 = vmul.f32 %v608_v49, %v554_v32 }
 0x4f5   : > { %v610_v51 = vpop.permute.xlu1 %609  ;;  %v612_v59 = vpop.permute.xlu0 %611 }
 0x4f6   : > { %v614_v52 = vmul.f32 %v1498_v45, %v610_v51 }
 0x4f8   : > { %v615_v57 = vadd.f32 %v614_v52, %v613_v47 }
 0x4fa   : > { %1499 = vtanh.f32 %v615_v57 }
 0x504   : > { %v1500_v58 = vpop.eup %1499 }
 0x505   : > { %v617_v60 = vmul.f32 %v1500_v58, %v612_v59 }
 0x507   : > { %v618_v61 = vpack.c.bf16 %v617_v60, %v617_v60 }
 0x509   : > { %1345 = vmatmul.mubr.bf16.vlgmr.msra.gmra.mrb[12].mxu0 %v618_v61 }
 0x50a   : > { %1369 = vmatpush3.bf16.msra.mxu0 %v1594_v0  ;;  %1384 = vmatprep.mubr.msk.bf16.mxu0 %vm1549_vm1, %v1548_v2 }
 0x50b   : > { %1370 = vmatprep.subr.bf16.mxu0 %v1548_v2 }
 0x50e   : > { %1371 = vmatpush3.bf16.msra.mxu0 %v1605_v3 }
 0x50f   : > { %1372 = vmatprep.subr.bf16.mxu0 %v1548_v2 }
 0x512   : > { %1373 = vmatpush3.bf16.msra.mxu0 %v1614_v8 }
 0x513   : > { %1374 = vmatprep.subr.bf16.mxu0 %v1548_v2 }
 0x516   : > { %1375 = vmatpush3.bf16.msra.mxu0 %v1620_v9 }
 0x517   : > { %1376 = vmatprep.subr.bf16.mxu0 %v1548_v2 }
 0x51a   : > { %1377 = vmatpush3.bf16.msra.mxu0 %v1633_v16 }
 0x51b   : > { %1378 = vmatprep.subr.bf16.mxu0 %v1548_v2 }
 0x51e   : > { %1379 = vmatpush3.bf16.msra.mxu0 %v1644_v18 }
 0x51f   : > { %1380 = vmatprep.subr.bf16.mxu0 %v1548_v2 }
 0x522   : > { %1381 = vmatpush3.bf16.msra.mxu0 %v1651_v19 }
 0x523   : > { %1382 = vmatprep.subr.bf16.mxu0 %v1548_v2 }
 0x526   : > { %1383 = vmatpush3.bf16.msra.mxu0 %v1658_v20 }
 0x527   : > { %1408 = vmatprep.subr.bf16.mxu0 %v1548_v2 }
 0x5dc   : > { %v653_v62 = vpop.f32.mrb[12].mxu0 }
 0x5dd   : > { %v659_v63 = vadd.f32 %v1723_v50, %v653_v62  ;;  %v1346_v1 = vpop.f32.mrb[13].mxu0 }
 0x5de   : > { %v656_v4 = vpop.f32.mrb[14].mxu0 }
 0x5df   : > { %v1147_v5 = vmul.f32 -1.442695, %v659_v63  ;;  %v1347_v6 = vpop.f32.mrb[15].mxu0 }
 0x5e1   : > { %1501 = vpow2.f32 %v1147_v5 }
 0x5eb   : > { %v1502_v7 = vpop.eup %1501 }
 0x5ec   : > { %v663_v10 = vadd.f32 1.0, %v1502_v7 }
 0x5ee   : > { %1503 = vrcp.f32 %v663_v10 }
 0x5f8   : > { %v1504_v11 = vpop.eup %1503 }
 0x5f9   : > { %668 = vrot.lane.b32.xlu1 %v1504_v11, %s1550_s21  ;;  %v666_v12 = vmul.f32 2.0, %v1504_v11 }
 0x5fb   : > { %v1148_v13 = vadd.f32 -1.0, %v666_v12 }
 0x5fd   : > { %672 = vrot.lane.b32.xlu1 %v1504_v11, %s1551_s22  ;;  %670 = vrot.lane.b32.xlu0 %v1148_v13, %s1552_s23 }
 0x66b   : > { %v669_v14 = vpop.permute.xlu1 %668 }
 0x66c   : > { %v674_v50 = vmul.f32 %v669_v14, %v615_v57 }
 0x66f   : > { %v671_v15 = vpop.permute.xlu0 %670  ;;  %v673_v24 = vpop.permute.xlu1 %672 }
 0x670   : > { %v675_v17 = vmul.f32 %v1504_v11, %v671_v15 }
 0x672   : > { %v676_v21 = vadd.f32 %v675_v17, %v674_v50 }
 0x674   : > { %1505 = vtanh.f32 %v676_v21 }
 0x67e   : > { %v1506_v23 = vpop.eup %1505 }
 0x67f   : > { %v678_v25 = vmul.f32 %v1506_v23, %v673_v24 }
 0x681   : > { %v679_v26 = vpack.c.bf16 %v678_v25, %v678_v25 }
 0x683   : > { %1365 = vmatmul.mubr.bf16.vlgmr.msra.gmra.mrb[8].mxu1 %v679_v26  ;;  %v1475_v26 = vld [vmem:[%s1917_s3] sm:$0xff]  }
 0x684   : > { %1389 = vmatpush3.bf16.msra.mxu1 %v1594_v0  ;;  %1404 = vmatprep.mubr.msk.bf16.mxu1 %vm1549_vm1, %v1548_v2 }
 0x685   : > { %1390 = vmatprep.subr.bf16.mxu1 %v1548_v2 }
 0x688   : > { %1391 = vmatpush3.bf16.msra.mxu1 %v1605_v3 }
 0x689   : > { %1392 = vmatprep.subr.bf16.mxu1 %v1548_v2 }
 0x68c   : > { %1393 = vmatpush3.bf16.msra.mxu1 %v1614_v8 }
 0x68d   : > { %1394 = vmatprep.subr.bf16.mxu1 %v1548_v2 }
 0x690   : > { %1395 = vmatpush3.bf16.msra.mxu1 %v1620_v9 }
 0x691   : > { %1396 = vmatprep.subr.bf16.mxu1 %v1548_v2 }
 0x694   : > { %1397 = vmatpush3.bf16.msra.mxu1 %v1633_v16 }
 0x695   : > { %1398 = vmatprep.subr.bf16.mxu1 %v1548_v2 }
 0x698   : > { %1399 = vmatpush3.bf16.msra.mxu1 %v1644_v18 }
 0x699   : > { %1400 = vmatprep.subr.bf16.mxu1 %v1548_v2 }
 0x69c   : > { %1401 = vmatpush3.bf16.msra.mxu1 %v1651_v19 }
 0x69d   : > { %1402 = vmatprep.subr.bf16.mxu1 %v1548_v2 }
 0x6a0   : > { %1403 = vmatpush3.bf16.msra.mxu1 %v1658_v20 }
 0x6a1   : > { %1428 = vmatprep.subr.bf16.mxu1 %v1548_v2 }
 0x756   : > { %v714_v27 = vpop.f32.mrb[8].mxu1 }
 0x757   : > { %v720_v28 = vadd.f32 %v714_v27, %v1727_v54  ;;  %v1366_v29 = vpop.f32.mrb[9].mxu1  ;;  %v1476_v27 = vld [vmem:[%s1917_s3 + $0x8] sm:$0xff]  }
 0x758   : > { %v717_v30 = vpop.f32.mrb[10].mxu1 }
 0x759   : > { %v1149_v31 = vmul.f32 -1.442695, %v720_v28  ;;  %v1367_v32 = vpop.f32.mrb[11].mxu1 }
 0x75b   : > { %1507 = vpow2.f32 %v1149_v31 }
 0x765   : > { %v1508_v33 = vpop.eup %1507 }
 0x766   : > { %v724_v34 = vadd.f32 1.0, %v1508_v33 }
 0x768   : > { %1509 = vrcp.f32 %v724_v34  ;;  %v1477_v34 = vld [vmem:[%s1917_s3 + $0x10] sm:$0xff]  }
 0x772   : > { %v1510_v35 = vpop.eup %1509 }
 0x773   : > { %729 = vrot.lane.b32.xlu0 %v1510_v35, %s1550_s21  ;;  %v727_v36 = vmul.f32 2.0, %v1510_v35 }
 0x775   : > { %v1150_v37 = vadd.f32 -1.0, %v727_v36 }
 0x777   : > { %733 = vrot.lane.b32.xlu0 %v1510_v35, %s1551_s22  ;;  %731 = vrot.lane.b32.xlu1 %v1150_v37, %s1552_s23  ;;  %v1478_v37 = vld [vmem:[%s1917_s3 + $0x18] sm:$0xff]  }
 0x7e5   : > { %v730_v38 = vpop.permute.xlu0 %729 }
 0x7e6   : > { %v735_v54 = vmul.f32 %v730_v38, %v676_v21  ;;  %v1480_v38 = vld [vmem:[%s1917_s3 + $0x28] sm:$0xff]  }
 0x7e9   : > { %v732_v39 = vpop.permute.xlu1 %731  ;;  %v734_v43 = vpop.permute.xlu0 %733 }
 0x7ea   : > { %v736_v40 = vmul.f32 %v1510_v35, %v732_v39 }
 0x7ec   : > { %v737_v41 = vadd.f32 %v736_v40, %v735_v54  ;;  %v1481_v54 = vld [vmem:[%s1917_s3 + $0x30] sm:$0xff]  }
 0x7ee   : > { %1511 = vtanh.f32 %v737_v41 }
 0x7f8   : > { %v1512_v42 = vpop.eup %1511 }
 0x7f9   : > { %v739_v44 = vmul.f32 %v1512_v42, %v734_v43  ;;  %v1482_v42 = vld [vmem:[%s1917_s3 + $0x38] sm:$0xff]  }
 0x7fb   : > { %v740_v45 = vpack.c.bf16 %v739_v44, %v739_v44 }
 0x7fd   : > { %1385 = vmatmul.mubr.bf16.vlgmr.msra.gmra.mrb[16].mxu0 %v740_v45 }
 0x7fe   : > { %1409 = vmatpush3.bf16.msra.mxu0 %v1594_v0  ;;  %1424 = vmatprep.mubr.msk.bf16.mxu0 %vm1549_vm1, %v1548_v2 }
 0x7ff   : > { %1410 = vmatprep.subr.bf16.mxu0 %v1548_v2 }
 0x802   : > { %1411 = vmatpush3.bf16.msra.mxu0 %v1605_v3 }
 0x803   : > { %1412 = vmatprep.subr.bf16.mxu0 %v1548_v2 }
 0x806   : > { %1413 = vmatpush3.bf16.msra.mxu0 %v1614_v8 }
 0x807   : > { %1414 = vmatprep.subr.bf16.mxu0 %v1548_v2 }
 0x80a   : > { %1415 = vmatpush3.bf16.msra.mxu0 %v1620_v9 }
 0x80b   : > { %1416 = vmatprep.subr.bf16.mxu0 %v1548_v2 }
 0x80e   : > { %1417 = vmatpush3.bf16.msra.mxu0 %v1633_v16 }
 0x80f   : > { %1418 = vmatprep.subr.bf16.mxu0 %v1548_v2 }
 0x812   : > { %1419 = vmatpush3.bf16.msra.mxu0 %v1644_v18 }
 0x813   : > { %1420 = vmatprep.subr.bf16.mxu0 %v1548_v2 }
 0x816   : > { %1421 = vmatpush3.bf16.msra.mxu0 %v1651_v19 }
 0x817   : > { %1422 = vmatprep.subr.bf16.mxu0 %v1548_v2 }
 0x81a   : > { %1423 = vmatpush3.bf16.msra.mxu0 %v1658_v20 }
 0x8d0   : > { %v775_v0 = vpop.f32.mrb[16].mxu0 }
 0x8d1   : > { %v781_v3 = vadd.f32 %v775_v0, %v1731_v56  ;;  %v1386_v8 = vpop.f32.mrb[17].mxu0 }
 0x8d2   : > { %v778_v9 = vpop.f32.mrb[18].mxu0 }
 0x8d3   : > { %v1151_v46 = vmul.f32 -1.442695, %v781_v3  ;;  %v1387_v48 = vpop.f32.mrb[19].mxu0 }
 0x8d5   : > { %1513 = vpow2.f32 %v1151_v46 }
 0x8df   : > { %v1514_v16 = vpop.eup %1513 }
 0x8e0   : > { %v785_v49 = vadd.f32 1.0, %v1514_v16 }
 0x8e2   : > { %1515 = vrcp.f32 %v785_v49 }
 0x8ec   : > { %v1516_v18 = vpop.eup %1515 }
 0x8ed   : > { %790 = vrot.lane.b32.xlu1 %v1516_v18, %s1550_s21  ;;  %v788_v51 = vmul.f32 2.0, %v1516_v18 }
 0x8ef   : > { %v1152_v19 = vadd.f32 -1.0, %v788_v51 }
 0x8f1   : > { %794 = vrot.lane.b32.xlu1 %v1516_v18, %s1551_s22  ;;  %792 = vrot.lane.b32.xlu0 %v1152_v19, %s1552_s23 }
 0x95f   : > { %v791_v20 = vpop.permute.xlu1 %790 }
 0x960   : > { %v796_v56 = vmul.f32 %v791_v20, %v737_v41 }
 0x963   : > { %v793_v47 = vpop.permute.xlu0 %792  ;;  %v795_v59 = vpop.permute.xlu1 %794 }
 0x964   : > { %v797_v52 = vmul.f32 %v1516_v18, %v793_v47 }
 0x966   : > { %v798_v57 = vadd.f32 %v797_v52, %v796_v56 }
 0x968   : > { %1517 = vtanh.f32 %v798_v57 }
 0x972   : > { %v1518_v58 = vpop.eup %1517 }
 0x973   : > { %v800_v60 = vmul.f32 %v1518_v58, %v795_v59 }
 0x975   : > { %v801_v61 = vpack.c.bf16 %v800_v60, %v800_v60 }
 0x977   : > { %1405 = vmatmul.mubr.bf16.vlgmr.msra.gmra.mrb[12].mxu1 %v801_v61 }
 0x978   : > { %1444 = vmatprep.mubr.msk.bf16.mxu1 %vm1549_vm1, %v1548_v2  ;;  %1429 = vmatpush3.bf16.msra.mxu1 %v1475_v26 }
 0x979   : > { %1430 = vmatprep.subr.bf16.mxu1 %v1548_v2 }
 0x97c   : > { %1431 = vmatpush3.bf16.msra.mxu1 %v1476_v27 }
 0x97d   : > { %1432 = vmatprep.subr.bf16.mxu1 %v1548_v2 }
 0x980   : > { %1433 = vmatpush3.bf16.msra.mxu1 %v1477_v34 }
 0x981   : > { %1434 = vmatprep.subr.bf16.mxu1 %v1548_v2 }
 0x984   : > { %1435 = vmatpush3.bf16.msra.mxu1 %v1478_v37 }
 0x985   : > { %1436 = vmatprep.subr.bf16.mxu1 %v1548_v2 }
 0xa4a   : > { %v836_v62 = vpop.f32.mrb[12].mxu1 }
 0xa4b   : > { %v842_v63 = vadd.f32 %v1725_v53, %v836_v62  ;;  %v1406_v1 = vpop.f32.mrb[13].mxu1 }
 0xa4c   : > { %v839_v4 = vpop.f32.mrb[14].mxu1 }
 0xa4d   : > { %v1153_v5 = vmul.f32 -1.442695, %v842_v63  ;;  %v1407_v6 = vpop.f32.mrb[15].mxu1 }
 0xa4f   : > { %1519 = vpow2.f32 %v1153_v5 }
 0xa59   : > { %v1520_v7 = vpop.eup %1519 }
 0xa5a   : > { %v846_v10 = vadd.f32 1.0, %v1520_v7 }
 0xa5c   : > { %1521 = vrcp.f32 %v846_v10 }
 0xa66   : > { %v1522_v11 = vpop.eup %1521 }
 0xa67   : > { %851 = vrot.lane.b32.xlu0 %v1522_v11, %s1550_s21  ;;  %v849_v12 = vmul.f32 2.0, %v1522_v11 }
 0xa69   : > { %v1154_v13 = vadd.f32 -1.0, %v849_v12 }
 0xa6b   : > { %855 = vrot.lane.b32.xlu0 %v1522_v11, %s1551_s22  ;;  %853 = vrot.lane.b32.xlu1 %v1154_v13, %s1552_s23 }
 0xad9   : > { %v852_v14 = vpop.permute.xlu0 %851 }
 0xada   : > { %v857_v53 = vmul.f32 %v852_v14, %v798_v57 }
 0xadd   : > { %v854_v15 = vpop.permute.xlu1 %853  ;;  %v856_v23 = vpop.permute.xlu0 %855 }
 0xade   : > { %v858_v50 = vmul.f32 %v1522_v11, %v854_v15 }
 0xae0   : > { %v859_v17 = vadd.f32 %v858_v50, %v857_v53 }
 0xae2   : > { %1523 = vtanh.f32 %v859_v17 }
 0xaec   : > { %v1524_v21 = vpop.eup %1523 }
 0xaed   : > { %v861_v24 = vmul.f32 %v1524_v21, %v856_v23 }
 0xaef   : > { %v862_v25 = vpack.c.bf16 %v861_v24, %v861_v24 }
 0xaf1   : > { %1425 = vmatmul.mubr.bf16.vlgmr.msra.gmra.mrb[20].mxu0 %v862_v25 }
 0xbc4   : > { %v897_v28 = vpop.f32.mrb[20].mxu0 }
 0xbc5   : > { %v903_v29 = vadd.f32 %v1729_v55, %v897_v28  ;;  %v1426_v30 = vpop.f32.mrb[21].mxu0  ;;  %v1479_v55 = vld [vmem:[%s1917_s3 + $0x20] sm:$0xff]  }
 0xbc6   : > { %v900_v31 = vpop.f32.mrb[22].mxu0  ;;  %1437 = vmatpush3.bf16.msra.mxu1 %v1479_v55 }
 0xbc7   : > { %v1155_v32 = vmul.f32 -1.442695, %v903_v29  ;;  %v1427_v33 = vpop.f32.mrb[23].mxu0  ;;  %1438 = vmatprep.subr.bf16.mxu1 %v1548_v2 }
 0xbc9   : > { %1525 = vpow2.f32 %v1155_v32 }
 0xbca   : > { %1439 = vmatpush3.bf16.msra.mxu1 %v1480_v38 }
 0xbcb   : > { %1440 = vmatprep.subr.bf16.mxu1 %v1548_v2 }
 0xbce   : > { %1441 = vmatpush3.bf16.msra.mxu1 %v1481_v54 }
 0xbcf   : > { %1442 = vmatprep.subr.bf16.mxu1 %v1548_v2  ;;  %v1157_v2 = vld [vmem:[%s1918_s4] ss:$0 sm:$0xff] }
 0xbd2   : > { %1443 = vmatpush3.bf16.msra.mxu1 %v1482_v42 }
 0xbd3   : > { %v1526_v35 = vpop.eup %1525 }
 0xbd4   : > { %v907_v36 = vadd.f32 1.0, %v1526_v35 }
 0xbd6   : > { %1527 = vrcp.f32 %v907_v36 }
 0xbe0   : > { %v1528_v39 = vpop.eup %1527 }
 0xbe1   : > { %912 = vrot.lane.b32.xlu1 %v1528_v39, %s1550_s21  ;;  %v910_v40 = vmul.f32 2.0, %v1528_v39 }
 0xbe3   : > { %v1156_v41 = vadd.f32 -1.0, %v910_v40 }
 0xbe5   : > { %916 = vrot.lane.b32.xlu1 %v1528_v39, %s1551_s22  ;;  %914 = vrot.lane.b32.xlu0 %v1156_v41, %s1552_s23  ;;  %s222_s22 = scalar_lea.vmem %s1919_s5, %s1126_s17 }
 0xc53   : > { %v913_v43 = vpop.permute.xlu1 %912 }
 0xc54   : > { %v918_v45 = vmul.f32 %v913_v43, %v859_v17 }
 0xc57   : > { %v915_v44 = vpop.permute.xlu0 %914  ;;  %v917_v9 = vpop.permute.xlu1 %916 }
 0xc58   : > { %v919_v0 = vmul.f32 %v1528_v39, %v915_v44 }
 0xc5a   : > { %v920_v3 = vadd.f32 %v919_v0, %v918_v45 }
 0xc5c   : > { %1529 = vtanh.f32 %v920_v3 }
 0xc66   : > { %v1530_v8 = vpop.eup %1529 }
 0xc67   : > { %v922_v46 = vmul.f32 %v1530_v8, %v917_v9 }
 0xc69   : > { %v923_v48 = vpack.c.bf16 %v922_v46, %v922_v46 }
 0xc6b   : > { %1445 = vmatmul.mubr.bf16.vlgmr.msra.gmra.mrb[16].mxu1 %v923_v48 }
 0xd3e   : > { %v1029_v16 = vpop.f32.mrb[16].mxu1 }
 0xd3f   : > { %v1030_v18 = vadd.f32 %v1157_v2, %v1029_v16  ;;  %v1446_v51 = vpop.f32.mrb[17].mxu1 }
 0xd40   : > { %v1032_v19 = vpop.f32.mrb[18].mxu1 }
 0xd41   : > { %v1447_v20 = vpop.f32.mrb[19].mxu1  ;;  %v1051_v47 = vsel %vm1890_vm13, %v1030_v18, -1e+30  ;;  %v1039_v56 = vsel %vm1035_vm14, %v1030_v18, -1e+30 }
 0xd42   : > { %1052 = vmax.xlane.f32.xlu0 %v1051_v47  ;;  %1040 = vmax.xlane.f32.xlu1 %v1039_v56 }
 0xdcf   : > { %v1053_v52 = vpop.xlane.xlu0 %1052  ;;  %v1041_v57 = vpop.xlane.xlu1 %1040 }
 0xdd0   : > { %v1054_v58 = vsub.f32 %v1030_v18, %v1053_v52  ;;  %v1042_v59 = vsub.f32 %v1030_v18, %v1041_v57 }
 0xdd2   : > { %v1055_v60 = vsel %vm1890_vm13, %v1054_v58, -1e+30  ;;  %v1043_v61 = vsel %vm1035_vm14, %v1042_v59, -1e+30 }
 0xdd3   : > { %v1056_v62 = vmul.f32 1.442695, %v1055_v60  ;;  %v1044_v63 = vmul.f32 1.442695, %v1043_v61 }
 0xdd5   : > { %1531 = vpow2.f32 %v1056_v62 }
 0xdd6   : > { %1533 = vpow2.f32 %v1044_v63 }
 0xddf   : > { %v1532_v1 = vpop.eup %1531 }
 0xde0   : > { %1058 = vadd.xlane.f32.xlu0 %v1532_v1  ;;  %v1534_v4 = vpop.eup %1533 }
 0xde4   : > { %1046 = vadd.xlane.f32.xlu0 %v1534_v4 }
 0xe6d   : > { %v1059_v5 = vpop.xlane.xlu0 %1058 }
 0xe6e   : > { %1535 = vlog2.f32 %v1059_v5 }
 0xe71   : > { %v1047_v6 = vpop.xlane.xlu0 %1046 }
 0xe72   : > { %1537 = vlog2.f32 %v1047_v6 }
 0xe78   : > { %v1536_v7 = vpop.eup %1535 }
 0xe79   : > { %v1061_v10 = vmul.f32 0.6931472, %v1536_v7 }
 0xe7b   : > { %v1062_v12 = vsub.f32 %v1054_v58, %v1061_v10 }
 0xe7c   : > { %v1538_v11 = vpop.eup %1537 }
 0xe7d   : > { %v1049_v13 = vmul.f32 0.6931472, %v1538_v11  ;;  %v1063_v15 = vsel %vm1890_vm13, %v1062_v12, 0.0 }
 0xe7f   : > { %v1050_v14 = vsub.f32 %v1042_v59, %v1049_v13 }
 0xe81   : > { %v1064_v53 = vsel %vm1035_vm14, %v1050_v14, %v1063_v15 }
 0xe82   : > { %1065 = vst [vmem:[%s222_s22] sm:$0xff] %v1064_v53 }
 0xe83 PF: > { %s15_s18 = sadd.s32 1, %s1545_s18  }
 0xe84   : > { %p12_p4 = scmp.ge.s32.totalorder %s15_s18, 4  }
 0xe86   :  { %14 = sbr.rel (!%p12_p4) target bundleno = 1 (0x1), region = 70 }

</bundles_post_ra>
